<compile_context>
chip_gen: v6e
topology: v6e:2x2x1
jax: 0.10.0
libtpu: 0.0.40
codegen_flags: <defaults>
</compile_context>

<pallas_src>
import functools

import jax
import jax.numpy as jnp
import numpy as np
from jax.experimental import pallas as pl
from jax.experimental.pallas import tpu as pltpu


def _round_up(v, m):
    return (v + m - 1) // m * m


def basic_block_kernel(p_ref, w_ref, o_ref, *, inv_hw):
    # p_ref: (K2C_pad, HW_pad)   im2col patches for one batch element (compute dtype, zero-padded)
    # w_ref: (co_tile, K2C_pad)  flattened conv weight (compute dtype, zero-padded)
    # o_ref: (co_tile, HW_pad)   lane-dense output slab (output dtype)
    acc = jnp.dot(w_ref[...], p_ref[...],
                  preferred_element_type=jnp.float32)          # MXU, f32 accumulate

    # InstanceNorm2d(affine=False), single-pass stats. Padded lane columns of acc are exactly
    # zero (zero patch columns), so sums over the padded axis equal sums over the true HW;
    # divide by the true HW explicitly (NOT jnp.mean over the padded width).
    s = jnp.sum(acc, axis=-1, keepdims=True)                    # XLU
    ss = jnp.sum(acc * acc, axis=-1, keepdims=True)             # XLU
    mean = s * inv_hw
    var = jnp.maximum(ss * inv_hw - mean * mean, 0.0)           # clamp: cancellation safety
    scale = jax.lax.rsqrt(var + 1e-5)                           # EUP; eps matches PyTorch
    shift = -mean * scale

    # Fused normalize + ReLU in a single pass over the full-width tile.
    o_ref[...] = jnp.maximum(acc * scale + shift, 0.0).astype(o_ref.dtype)


def basic_block(x, w, b=None, *, k=3, s=1, p=1, co_tile=None,
                compute_dtype=jnp.bfloat16, out_dtype=None):
    """x: (N, C_in, H, W), w: (C_out, C_in, k, k), b: (C_out,) or None.

    Returns (N, C_out, Ho, Wo). `b` is accepted for API parity with nn.Conv2d but is
    intentionally unused: InstanceNorm2d(affine=False) cancels a per-channel bias exactly.
    """
    assert s == 1, "only stride 1 implemented (module default)"
    N, c_in, H, W = x.shape
    c_out = w.shape[0]
    Ho = (H + 2 * p - k) // s + 1
    Wo = (W + 2 * p - k) // s + 1
    HW = Ho * Wo
    K2C = c_in * k * k
    out_dtype = x.dtype if out_dtype is None else out_dtype

    # Padding targets: lane axis (HW) to 128; contraction axis to the sublane pack.
    sub = 16 if jnp.dtype(compute_dtype) == jnp.dtype(jnp.bfloat16) else 8
    K2C_pad = _round_up(K2C, sub)
    HW_pad = _round_up(HW, 128)

    # Cast to compute dtype BEFORE im2col so the 9x intermediate lives in HBM at bf16.
    xc = x.astype(compute_dtype)
    patches = jax.lax.conv_general_dilated_patches(
        xc, filter_shape=(k, k), window_strides=(s, s),
        padding=((p, p), (p, p)),
        dimension_numbers=("NCHW", "OIHW", "NCHW"))
    # Feature index = c*k*k + dy*k + dx, matching w.reshape(C_out, C_in*k*k) OIHW row-major.
    patches = patches.reshape(N, K2C, HW)
    if K2C_pad != K2C or HW_pad != HW:
        patches = jnp.pad(patches,
                          ((0, 0), (0, K2C_pad - K2C), (0, HW_pad - HW)))

    w_flat = w.reshape(c_out, K2C).astype(compute_dtype)
    if K2C_pad != K2C:
        w_flat = jnp.pad(w_flat, ((0, 0), (0, K2C_pad - K2C)))

    if co_tile is None:
        co_tile = min(c_out, 256)           # cap the output tile; keep >=2 grid blocks when possible
        while c_out % co_tile:
            co_tile -= 1
    assert c_out % co_tile == 0

    # Explicit VMEM budget: double-buffered patches + weights + output, plus the f32 acc.
    cbytes = jnp.dtype(compute_dtype).itemsize
    obytes = jnp.dtype(out_dtype).itemsize
    est = (2 * K2C_pad * HW_pad * cbytes
           + 2 * co_tile * K2C_pad * cbytes
           + 2 * co_tile * HW_pad * obytes
           + co_tile * HW_pad * 4)
    vmem_limit = int(min(max(est + (4 << 20), 32 << 20), 96 << 20))

    kern = functools.partial(basic_block_kernel, inv_hw=1.0 / float(HW))

    out = pl.pallas_call(
        kern,
        out_shape=jax.ShapeDtypeStruct((N, c_out, HW_pad), out_dtype),
        grid_spec=pltpu.PrefetchScalarGridSpec(
            num_scalar_prefetch=0,
            grid=(N, c_out // co_tile),
            in_specs=[
                # patches block ignores the co axis -> stays resident across co steps.
                pl.BlockSpec((None, K2C_pad, HW_pad), lambda n, co: (n, 0, 0)),
                pl.BlockSpec((co_tile, K2C_pad), lambda n, co: (co, 0)),
            ],
            out_specs=pl.BlockSpec((None, co_tile, HW_pad), lambda n, co: (n, co, 0)),
        ),
        compiler_params=pltpu.CompilerParams(
            dimension_semantics=("parallel", "parallel"),
            vmem_limit_bytes=vmem_limit),
    )(patches, w_flat)

    # Slice off the HW lane padding and restore NCHW in the wrapper (cheap XLA layout work).
    return out[:, :, :HW].reshape(N, c_out, Ho, Wo)


def basic_block_ref(x, w, b):
    """Pure-JAX reference (includes the bias, which instance-norm cancels)."""
    y = jax.lax.conv_general_dilated(
        x, w, window_strides=(1, 1), padding=((1, 1), (1, 1)),
        dimension_numbers=("NCHW", "OIHW", "NCHW"))
    y = y + b[None, :, None, None]
    mean = y.mean(axis=(2, 3), keepdims=True)
    var = ((y - mean) ** 2).mean(axis=(2, 3), keepdims=True)
    y = (y - mean) / jnp.sqrt(var + 1e-5)
    return jnp.maximum(y, 0.0)


if __name__ == "__main__":
    key = jax.random.PRNGKey(0)
    kx, kw, kb = jax.random.split(key, 3)

    N, c_in, c_out, H, W, K = 2, 4, 8, 16, 16, 3

    x = jax.random.normal(kx, (N, c_in, H, W), dtype=jnp.float32)
    fan_in = c_in * K * K
    w = jax.random.uniform(kw, (c_out, c_in, K, K), dtype=jnp.float32,
                           minval=-1.0, maxval=1.0) / jnp.sqrt(fan_in)
    b = jax.random.uniform(kb, (c_out,), dtype=jnp.float32,
                           minval=-1.0, maxval=1.0) / jnp.sqrt(fan_in)

    ref = jax.block_until_ready(basic_block_ref(x, w, b))

    # f32-operand path: tight numerical check of patch/weight flattening + fused epilogue.
    out_f32 = jax.block_until_ready(basic_block(x, w, b, compute_dtype=jnp.float32))
    np.testing.assert_allclose(np.asarray(out_f32), np.asarray(ref), rtol=1e-3, atol=1e-3)

    # bf16-operand path (default / perf config): looser tolerance for bf16 MXU inputs.
    out_bf16 = jax.block_until_ready(basic_block(x, w, b))
    np.testing.assert_allclose(np.asarray(out_bf16), np.asarray(ref), rtol=5e-2, atol=5e-2)

    print("KERNEL_OK")
</pallas_src>

<mosaic_0001>
module attributes {stable_mosaic.version = 11 : i64} {
  func.func @basic_block_kernel(%arg0: i32, %arg1: i32, %arg2: memref<1x40x256xf32, #tpu.memory_space<vmem>>, %arg3: memref<8x40xf32, #tpu.memory_space<vmem>>, %arg4: memref<1x8x256xf32, #tpu.memory_space<vmem>>) attributes {dimension_semantics = [#tpu.dimension_semantics<parallel>, #tpu.dimension_semantics<parallel>], iteration_bounds = array<i64: 2, 1>, scalar_prefetch = 0 : i64, scratch_operands = 0 : i64, tpu.core_type = #tpu.core_type<tc>, window_params = [{transform_indices = @transform_0, window_bounds = array<i64: 1, 40, 256>}, {transform_indices = @transform_1, window_bounds = array<i64: 8, 40>}, {transform_indices = @transform_2, window_bounds = array<i64: 1, 8, 256>}]} {
    %c0 = arith.constant 0 : index
    %c0_0 = arith.constant 0 : index
    %0 = vector.load %arg3[%c0, %c0_0] : memref<8x40xf32, #tpu.memory_space<vmem>>, vector<8x40xf32>
    %c0_1 = arith.constant 0 : index
    %c0_2 = arith.constant 0 : index
    %c0_3 = arith.constant 0 : index
    %1 = vector.load %arg2[%c0_1, %c0_2, %c0_3] : memref<1x40x256xf32, #tpu.memory_space<vmem>>, vector<1x40x256xf32>
    %2 = vector.shape_cast %1 : vector<1x40x256xf32> to vector<40x256xf32>
    %cst = arith.constant dense<0.000000e+00> : vector<8x256xf32>
    %3 = tpu.matmul %0, %2, %cst {dimension_numbers = #tpu.dot_dimension_numbers<[1], [0], [0], [1], [0, 0, 1, 1], [], []>} : vector<8x40xf32>, vector<40x256xf32>, vector<8x256xf32> -> vector<8x256xf32>
    %cst_4 = arith.constant dense<0.000000e+00> : vector<8xf32>
    %4 = vector.multi_reduction <add>, %3, %cst_4 [1] : vector<8x256xf32> to vector<8xf32>
    %5 = vector.shape_cast %4 : vector<8xf32> to vector<8x1xf32>
    %6 = arith.mulf %3, %3 : vector<8x256xf32>
    %cst_5 = arith.constant dense<0.000000e+00> : vector<8xf32>
    %7 = vector.multi_reduction <add>, %6, %cst_5 [1] : vector<8x256xf32> to vector<8xf32>
    %8 = vector.shape_cast %7 : vector<8xf32> to vector<8x1xf32>
    %cst_6 = arith.constant 3.906250e-03 : f32
    %9 = vector.broadcast %cst_6 : f32 to vector<8x1xf32>
    %10 = arith.mulf %5, %9 : vector<8x1xf32>
    %cst_7 = arith.constant 3.906250e-03 : f32
    %11 = vector.broadcast %cst_7 : f32 to vector<8x1xf32>
    %12 = arith.mulf %8, %11 : vector<8x1xf32>
    %13 = arith.mulf %10, %10 : vector<8x1xf32>
    %14 = arith.subf %12, %13 : vector<8x1xf32>
    %cst_8 = arith.constant 0.000000e+00 : f32
    %15 = vector.broadcast %cst_8 : f32 to vector<8x1xf32>
    %16 = arith.maximumf %14, %15 : vector<8x1xf32>
    %cst_9 = arith.constant 9.99999974E-6 : f32
    %17 = vector.broadcast %cst_9 : f32 to vector<8x1xf32>
    %18 = arith.addf %16, %17 : vector<8x1xf32>
    %19 = math.rsqrt %18 : vector<8x1xf32>
    %cst_10 = arith.constant 0.000000e+00 : f32
    %20 = vector.broadcast %cst_10 : f32 to vector<8x1xf32>
    %21 = arith.subf %20, %10 : vector<8x1xf32>
    %22 = arith.mulf %21, %19 : vector<8x1xf32>
    %23 = vector.broadcast %19 : vector<8x1xf32> to vector<8x256xf32>
    %24 = arith.mulf %3, %23 : vector<8x256xf32>
    %25 = vector.broadcast %22 : vector<8x1xf32> to vector<8x256xf32>
    %26 = arith.addf %24, %25 : vector<8x256xf32>
    %cst_11 = arith.constant 0.000000e+00 : f32
    %27 = vector.broadcast %cst_11 : f32 to vector<8x256xf32>
    %28 = arith.maximumf %26, %27 : vector<8x256xf32>
    %c0_12 = arith.constant 0 : index
    %c0_13 = arith.constant 0 : index
    %c0_14 = arith.constant 0 : index
    %29 = vector.load %arg4[%c0_12, %c0_13, %c0_14] : memref<1x8x256xf32, #tpu.memory_space<vmem>>, vector<1x8x256xf32>
    %30 = vector.shape_cast %29 : vector<1x8x256xf32> to vector<8x256xf32>
    %31 = vector.shape_cast %28 : vector<8x256xf32> to vector<1x8x256xf32>
    tpu.vector_store %arg4[%c0_12, %c0_13, %c0_14], %31 {strides = array<i32>} : memref<1x8x256xf32, #tpu.memory_space<vmem>>, vector<1x8x256xf32>,
    return
  }
  func.func @transform_0(%arg0: i32, %arg1: i32) -> (i32, i32, i32) {
    %c0_i32 = arith.constant 0 : i32
    %c0_i32_0 = arith.constant 0 : i32
    %c0_i32_1 = arith.constant 0 : i32
    return %arg0, %c0_i32, %c0_i32_0 : i32, i32, i32
  }
  func.func @transform_1(%arg0: i32, %arg1: i32) -> (i32, i32) {
    %c0_i32 = arith.constant 0 : i32
    %c0_i32_0 = arith.constant 0 : i32
    return %arg1, %c0_i32 : i32, i32
  }
  func.func @transform_2(%arg0: i32, %arg1: i32) -> (i32, i32, i32) {
    %c0_i32 = arith.constant 0 : i32
    %c0_i32_0 = arith.constant 0 : i32
    return %arg0, %arg1, %c0_i32 : i32, i32, i32
  }
}

</mosaic_0001>

<bundles_post_ra>
// kernel: tpu_custom_call.1
= control target key start
LH: loop header
LB: loop body
LE: loop exit
PB: predicated region body
PF: predicated region fallthrough
CT: control target
= control target key end

     0   :  { %7 = vsyncpa [#allocation3], 0  ;;  %s845_s0 = inlined_call_operand.hbm [shape: f32[2,40,256], index: 0, kind: input, shape index: {}]   ;;  %s846_s1 = inlined_call_operand.hbm [shape: f32[8,40], index: 1, kind: input, shape index: {}]   ;;  %s847_s2 = inlined_call_operand.hbm [shape: f32[2,8,256], index: 2, kind: output, shape index: {}]  }
   0x1   :  { %9 = vsyncpa [#allocation3 + $0x1], 0 }
   0x2   :  { %10 = vsyncpa [#allocation6], 0 }
   0x3   :  { %11 = vsyncpa [#allocation4], 0 }
   0x4   :  { %13 = vsyncpa [#allocation4 + $0x1], 0  ;;  %s675_s9 = smov 0   ;;  %s677_s10 = smov 0  }
   0x5   :  { %s679_s11 = smov 0   ;;  %s681_s12 = smov 0  }
   0x6   :  { %s683_s13 = smov 0   ;;  %s685_s14 = smov 0  }
   0x7 LB: > { %s417_s15 = sadd.s32 4294967295, %s652_s14   ;;  %s418_s16 = sadd.s32 4294967294, %s652_s14   ;;  %s652_s14 = sphi %s685_s14, %s19_s14   ;;  %s648_s13 = sphi %s683_s13, %s866_s13   ;;  %s644_s12 = sphi %s681_s12, %s865_s12   ;;  %s640_s11 = sphi %s679_s11, %s864_s11   ;;  %s636_s10 = sphi %s677_s10, %s863_s10   ;;  %s632_s9 = sphi %s675_s9, %s862_s9  }
   0x8   : > { %s38_s17 = sadd.s32 1, %s640_s11  ;;  %p45_p0 = scmp.ne.s32.totalorder %s640_s11, %s636_s10 }
   0x9   : > { %p46_p1 = scmp.eq.s32.totalorder %s652_s14, 0  ;;  %p51_p2 = scmp.ne.s32.totalorder %s636_s10, %s632_s9 }
   0xa   : > { %p713_p3 = scmp.eq.s32.totalorder %s417_s15, 0  ;;  %p103_p4 = scmp.eq.s32.totalorder %s417_s15, 1 }
   0xb   : > { %p717_p5 = por %p46_p1, %p45_p0  ;;  %p109_p6 = scmp.eq.s32.totalorder %s418_s16, 1 }
   0xc   : > { %p723_p7 = por %p713_p3, %p51_p2  ;;  %p727_p8 = por %p103_p4, %p45_p0 }
   0xd   : > { %p731_p9 = por %p109_p6, %p51_p2  ;;  %p419_p10 = scmp.ge.s32.totalorder %s652_s14, 1 }
   0xe   : > { %s852_s20 = scalar_select %p723_p7, 1, 0 }
   0xf   : > { %s853_s21 = scalar_select %p727_p8, 1, 0 }
  0x10   : > { %s854_s22 = scalar_select %p731_p9, 1, 0 }
  0x11   : > { %p116_p11 = scmp.lt.s32.totalorder %s652_s14, 3  ;;  %s654_s24 = smov [#allocation5]  }
  0x12   : > { %s131_s25 = sshll.u32 %s654_s24, 4  ;;  %p457_p1 = scmp.lt.s32.totalorder %s652_s14, 2  ;;  %s132_s25 = int_to_ptr.vmem [resolvable:$true] %s131_s25 }
  0x13   : > { %p738_p13 = pnand %p419_p10, %p116_p11  ;;  %s31_s28 = sadd.s32 1, %s648_s13 }
  0x14   : > { %p747_p4 = pnand %p457_p1, %p717_p5  ;;  %p33_p6 = scmp.ge.s32.totalorder %s31_s28, 2 }
  0x15   : > { %p444_p0 = pneg %p738_p13  ;;  %s142_s29 = sand.u32 1, %s640_s11  }
  0x16   : > { %s525_s30 = scalar_lea.vmem %s132_s25, 128  ;;  %p533_p8 = scmp.lt.s32.totalorder %s132_s25, %s132_s25 }
  0x17   : > { %p753_p2 = pnand %p444_p0, %p713_p3  ;;  %p526_p11 = scmp.ne.s32.totalorder %s132_s25, %s525_s30 }
  0x18   : > { %p534_p5 = scmp.lt.s32.totalorder %s525_s30, %s525_s30 }
  0x19   : > { %p516_p10 = pneg %p753_p2 }
  0x1a   : > { %p535_p1 = por %p534_p5, %p533_p8 }
  0x1b   : > { %p528_p12 = pnand %p526_p11, %p516_p10 }
  0x1d   : > { %p529_p9 = pneg %p528_p12 }
  0x1f   : > { %p536_p7 = pnand %p535_p1, %p529_p9 }
  0x21   : > { %539 = shalt.err (!%p536_p7)
}
  0x22   : > { %447 = dma.hbm_to_vmem [thread:$0]  (!%p753_p2), %s846_s1, 128, %s132_s25, [#allocation6]  }
  0x23   : > { %s868_s28 = smov (%p33_p6, %s31_s28), 0  ;;  %s433_s5 = smul.u32 80, %s142_s29 }
  0x24   : > { %s35_s6 = ssub.s32 %s648_s13, %s868_s28  ;;  %s434_s7 = smul.u32 1280, %s648_s13 }
  0x25   : > { %p36_p8 = scmp.eq.s32.totalorder %s35_s6, 0  ;;  %s146_s19 = scalar_lea.vmem [#allocation2], %s433_s5 }
  0x26   : > { %s152_s16 = scalar_lea.hbm %s845_s0, %s434_s7  ;;  %s153_s24 = sshll.u32 %s146_s19, 4  ;;  %s154_s24 = int_to_ptr.vmem [resolvable:$true] %s153_s24 }
  0x27   : > { %s777_s27 = scalar_select %p36_p8, %s640_s11, %s38_s17  }
  0x28   : > { %s143_s30 = scalar_lea.sflag [#allocation3], %s142_s29  ;;  %p542_p7 = pneg %p747_p4 }
  0x29   : > { %s553_s25 = scalar_lea.vmem %s154_s24, 1280  ;;  %s655_s3 = smov [#allocation2]  }
  0x2a   : > { %p554_p9 = scmp.ne.s32.totalorder %s154_s24, %s553_s25  ;;  %s558_s4 = sshll.u32 %s655_s3, 4  ;;  %s559_s4 = int_to_ptr.vmem [resolvable:$false] %s558_s4 }
  0x2b   : > { %s560_s6 = scalar_lea.vmem %s559_s4, 2560  ;;  %p561_p2 = scmp.lt.s32.totalorder %s154_s24, %s559_s4 }
  0x2c   : > { %p556_p12 = pnand %p554_p9, %p542_p7  ;;  %p562_p6 = scmp.lt.s32.totalorder %s560_s6, %s553_s25 }
  0x2e   : > { %p557_p0 = pneg %p556_p12  ;;  %p563_p10 = por %p562_p6, %p561_p2 }
  0x30   : > { %p564_p11 = pnand %p563_p10, %p557_p0 }
  0x32   : > { %567 = shalt.err (!%p564_p11)
}
  0x33   : > { %s656_s5 = smov 256   ;;  %s657_s17 = smov 16  }
  0x34   : > { %451 = dma.hbm_to_vmem [thread:$0]  (!%p747_p4), %s152_s16, 1280, %s154_s24, %s143_s30, %s656_s5, %s656_s5, %s657_s17  }
  0x35   : > { %165 = sbr.rel (%p738_p13) target bundleno = 452 (0x1c4), region = 28  ;;  %s786_s29 = sand.u32 (!%p738_p13), 1, %s636_s10  }
  0x36   : > { %s435_s7 = smul.u32 (!%p738_p13), 80, %s786_s29  ;;  %s168_s8 = scalar_lea.sflag (!%p738_p13), [#allocation3], %s786_s29 }
  0x37   : > { %p858_p5 = scmp.ne.s32.totalorder (!%p738_p13), %s852_s20, 0 }
  0x38   : > { %s171_s15 = scalar_lea.vmem (!%p738_p13), [#allocation2], %s435_s7 }
  0x3a   : > { %619 = dma.done.wait (%p858_p5), %s168_s8, 1280  }
  0x3b   : > { %621 = vsyncadd (%p858_p5), %s168_s8, 4294966016 }
  0x3c   : > { %623 = dma.done.wait (%p713_p3), [#allocation6], 128  }
  0x3d   : > { %625 = vsyncadd (%p713_p3), [#allocation6], 4294967168  ;;  %v658_v0 = vmov 0.0   ;;  %v206_v1 = vld [vmem:[%s171_s15 + $0x48] sm:$0xff]  ;;  %v205_v2 = vld [vmem:[%s171_s15 + $0x40] sm:$0xff]  ;;  %vm207_vm0 = vcmask 326656  }
  0x3e   : > { %275 = vmatprep.mubr.f32.mxu0 %v658_v0  ;;  %v204_v3 = vld [vmem:[%s171_s15 + $0x38] sm:$0xff]  ;;  %233 = vmatprep.subr.mxu0 %v206_v1  ;;  %v203_v4 = vld [vmem:[%s171_s15 + $0x30] sm:$0xff]  ;;  %v202_v5 = vld [vmem:[%s171_s15 + $0x28] sm:$0xff]  ;;  %s425_s18 = sshll.u32 %s786_s29, 4  ;;  %s432_s20 = sshll.u32 %s644_s12, 8 }
  0x3f   : > { %234 = vmatpush1.msra.mxu0 %v205_v2  ;;  %v201_v6 = vld [vmem:[%s171_s15 + $0x20] sm:$0xff]  ;;  %v200_v7 = vld [vmem:[%s171_s15 + $0x18] sm:$0xff]  ;;  %v199_v8 = vld [vmem:[%s171_s15 + $0x10] sm:$0xff]  ;;  %s195_s23 = scalar_lea.vmem [#allocation7], %s425_s18  ;;  %s803_s24 = scalar_lea.hbm %s847_s2, %s432_s20 }
  0x40   : > { %235 = vmatprep.subr.mxu0 %v204_v3  ;;  %v198_v9 = vld [vmem:[%s171_s15 + $0x8] sm:$0xff]  ;;  %v197_v10 = vld [vmem:[%s171_s15] sm:$0xff]  ;;  %s324_s26 = sshll.u32 %s195_s23, 4  ;;  %s308_s30 = scalar_lea.sflag [#allocation4], %s786_s29  ;;  %s325_s26 = int_to_ptr.vmem [resolvable:$true] %s324_s26 }
  0x41   : > { %236 = vmatpush1.msra.mxu0 %v203_v4  ;;  %v196_v11 = vld [vmem:[#allocation5] sm:$0xff]  ;;  %s568_s25 = scalar_lea.vmem %s325_s26, 256  ;;  %p859_p13 = scmp.ne.s32.totalorder %s853_s21, 0 }
  0x42   : > { %237 = vmatprep.subr.mxu0 %v202_v5  ;;  %p569_p3 = scmp.ne.s32.totalorder %s325_s26, %s568_s25  ;;  %s659_s12 = smov [#allocation7]  }
  0x43   : > { %238 = vmatpush1.msra.mxu0 %v201_v6  ;;  %s572_s3 = sshll.u32 %s659_s12, 4  ;;  %s573_s3 = int_to_ptr.vmem [resolvable:$false] %s572_s3 }
  0x44   : > { %239 = vmatprep.subr.mxu0 %v200_v7  ;;  %p570_p4 = pnand %p569_p3, %p859_p13  ;;  %s574_s4 = scalar_lea.vmem %s573_s3, 512 }
  0x45   : > { %240 = vmatpush1.msra.mxu0 %v199_v8  ;;  %p575_p8 = scmp.lt.s32.totalorder %s325_s26, %s573_s3  ;;  %p576_p7 = scmp.lt.s32.totalorder %s574_s4, %s568_s25 }
  0x46   : > { %241 = vmatprep.subr.mxu0 %v198_v9  ;;  %p571_p1 = pneg %p570_p4 }
  0x47   : > { %242 = vmatpush1.msra.mxu0 %v197_v10  ;;  %p577_p9 = por %p576_p7, %p575_p8 }
  0x48   : > { %426 = vmatmul.mubr.msk.f32.vlgmr.msra.gmra.mxu0 %vm207_vm0, %v196_v11 }
  0x49   : > { %p578_p12 = pnand %p577_p9, %p571_p1 }
 0x108   : > { %v277_v12 = vpop.f32.mrf.mxu0 }
 0x109   : > { %v285_v16 = vmul.f32 %v277_v12, %v277_v12 }
 0x10a   : > { %v279_v13 = vpop.f32.mrf.mxu0 }
 0x10b   : > { %v286_v14 = vmul.f32 %v279_v13, %v279_v13  ;;  %v282_v15 = vadd.f32 %v279_v13, %v277_v12 }
 0x10d   : > { %283 = vadd.xlane.f32.xlu0 %v282_v15  ;;  %v287_v17 = vadd.f32 %v286_v14, %v285_v16 }
 0x111   : > { %288 = vadd.xlane.f32.xlu0 %v287_v17 }
 0x196   : > { %v284_v18 = vpop.xlane.xlu0 %283 }
 0x197   : > { %v290_v19 = vmul.f32 0.00390625, %v284_v18 }
 0x199   : > { %v292_v21 = vmul.f32 %v290_v19, %v290_v19  ;;  %v297_v26 = vsub.f32 0.0, %v290_v19 }
 0x19a   : > { %v289_v20 = vpop.xlane.xlu0 %288 }
 0x19b   : > { %v291_v22 = vmul.f32 0.00390625, %v289_v20 }
 0x19d   : > { %v293_v23 = vsub.f32 %v291_v22, %v292_v21 }
 0x19f   : > { %v294_v24 = vmax.f32 %v293_v23, 0.0 }
 0x1a1   : > { %v295_v25 = vadd.f32 1e-05, %v294_v24 }
 0x1a3   : > { %512 = vrsqrt.f32 %v295_v25 }
 0x1b0   : > { %v513_v27 = vpop.eup %512 }
 0x1b1   : > { %v298_v28 = vmul.f32 %v513_v27, %v297_v26  ;;  %v299_v29 = vmul.f32 %v513_v27, %v277_v12  ;;  %v300_v30 = vmul.f32 %v513_v27, %v279_v13 }
 0x1b3   : > { %v301_v31 = vadd.f32 %v299_v29, %v298_v28  ;;  %v302_v32 = vadd.f32 %v300_v30, %v298_v28 }
 0x1b5   : > { %v303_v33 = vmax.f32 %v301_v31, 0.0  ;;  %v304_v34 = vmax.f32 %v302_v32, 0.0 }
 0x1b7   : > { %305 = vst [vmem:[%s195_s23] sm:$0xff] %v303_v33  ;;  %306 = vst [vmem:[%s195_s23 + $0x8] sm:$0xff] %v304_v34 }
 0x1b8   : > { %581 = shalt.err (!%p578_p12)
}
 0x1b9   : > { %s582_s6 = scalar_lea.hbm %s803_s24, 256  ;;  %s586_s29 = scalar_lea.hbm %s847_s2, 512 }
 0x1ba   : > { %p583_p0 = scmp.ne.s32.totalorder %s803_s24, %s582_s6  ;;  %p587_p10 = scmp.lt.s32.totalorder %s803_s24, %s847_s2 }
 0x1bb   : > { %p588_p11 = scmp.lt.s32.totalorder %s586_s29, %s582_s6 }
 0x1bc   : > { %p584_p2 = pnand %p583_p0, %p859_p13 }
 0x1bd   : > { %p589_p5 = por %p588_p11, %p587_p10 }
 0x1be   : > { %p585_p6 = pneg %p584_p2 }
 0x1c0   : > { %p590_p3 = pnand %p589_p5, %p585_p6 }
 0x1c2   : > { %593 = shalt.err (!%p590_p3)
}
 0x1c3   : > { %442 = dma.vmem_to_hbm [thread:$0]  (%p859_p13), %s325_s26, 256, %s803_s24, %s308_s30  }
 0x1c4 PF: > { %s336_s15 = sand.u32 1, %s632_s9   ;;  %p860_p4 = scmp.ne.s32.totalorder %s854_s22, 0 }
 0x1c5   : > { %p861_p1 = scmp.ge.s32.totalorder %s652_s14, 2  ;;  %s337_s18 = scalar_lea.sflag [#allocation4], %s336_s15 }
 0x1c7   : > { %p453_p8 = pnand %p861_p1, %p860_p4 }
 0x1c9   : > { %p454_p7 = pneg %p453_p8 }
 0x1cb   : > { %627 = dma.done.wait (%p454_p7), %s337_s18, 256  }
 0x1cc   : > { %629 = vsyncadd (%p454_p7), %s337_s18, 4294967040  ;;  %s19_s14 = sadd.s32 1, %s652_s14   ;;  %s862_s9 = smov %s636_s10 }
 0x1cd   : > { %p16_p9 = scmp.ge.s32.totalorder %s19_s14, 4   ;;  %s863_s10 = smov %s640_s11 }
 0x1ce   : > { %s864_s11 = smov %s777_s27  ;;  %s865_s12 = smov %s648_s13 }
 0x1cf   : > { %s866_s13 = smov %s868_s28  ;;  %18 = sbr.rel (!%p16_p9) target bundleno = 7 (0x7), region = 78 }
 0x1d4   :  { %342 = vsyncpa [#allocation3], 1 }
 0x1d5   :  { %344 = vsyncpa [#allocation3 + $0x1], 1 }
 0x1d6   :  { %345 = vsyncpa [#allocation6], 1 }
 0x1d7   :  { %346 = vsyncpa [#allocation4], 1 }
 0x1d8   :  { %348 = vsyncpa [#allocation4 + $0x1], 1 }

</bundles_post_ra>
